<compile_context>
chip_gen: v5e
topology: v5e:2x2
jax: 0.10.0
libtpu: 0.0.40
codegen_flags: <defaults>
</compile_context>

<pallas_src>
import jax
import jax.numpy as jnp
from jax.experimental import pallas as pl
from jax.experimental.pallas import tpu as pltpu

H1 = 512   # padded hidden size 1 (logical 400)
H2 = 384   # padded hidden size 2 (logical 300)


def _round_up(n, m):
    return ((n + m - 1) // m) * m


def _cdiv(a, b):
    return (a + b - 1) // b


def critic_kernel(xu_ref, w1_ref, b1_ref, w2_ref, b2_ref, w3_ref, b3_ref,
                  out_ref):
    # Layer 1: h1 = relu([x|u] @ W1 + b1) -- single fused K=K_IN MXU pass,
    # bf16 operands with f32 accumulation.
    h1 = jnp.dot(xu_ref[...], w1_ref[...], preferred_element_type=jnp.float32)
    h1 = jnp.maximum(h1 + b1_ref[...], 0.0)

    # Layer 2: h2 = relu(h1 @ W2 + b2)
    h2 = jnp.dot(h1.astype(jnp.bfloat16), w2_ref[...],
                 preferred_element_type=jnp.float32)
    h2 = jnp.maximum(h2 + b2_ref[...], 0.0)

    # Layer 3 (out_features == 1): VPU broadcast-multiply + lane reduction
    # instead of a degenerate 1-column MXU matmul.
    w3 = w3_ref[...].astype(jnp.float32)                 # (1, H2)
    q = jnp.sum(h2 * w3, axis=-1, keepdims=True)         # (tile_b, 1)
    out_ref[...] = q + b3_ref[0, 0]                      # scalar bias from SMEM


def init_critic_params(key, state_dim, action_dim):
    """f32 'logical' params mimicking nn.Linear default init U(-1/sqrt(fan_in), +).
    Weights stored as (in_features, out_features); biases as (1, out_features)."""
    dims = [(state_dim + action_dim, 400), (400, 300), (300, 1)]
    params = []
    for i, (fan_in, fan_out) in enumerate(dims):
        kw, kb, key = jax.random.split(jax.random.fold_in(key, i), 3)
        bound = 1.0 / (fan_in ** 0.5)
        w = jax.random.uniform(kw, (fan_in, fan_out), jnp.float32, -bound, bound)
        b = jax.random.uniform(kb, (1, fan_out), jnp.float32, -bound, bound)
        params += [w, b]
    return tuple(params)


def pack_critic_params(params):
    """Pad W1 rows to K_IN = round_up(S+A, 8) and hidden dims to (H1, H2);
    cast weights to bf16 (biases stay f32).  Done once, outside the kernel."""
    w1, b1, w2, b2, w3, b3 = params
    k_in = _round_up(w1.shape[0], 8)

    def pad2(a, rows, cols):
        return jnp.pad(a, ((0, rows - a.shape[0]), (0, cols - a.shape[1])))

    w1p = pad2(w1, k_in, H1).astype(jnp.bfloat16)      # stacked [Wx; Wu; 0] rows
    b1p = pad2(b1, 1, H1).astype(jnp.float32)
    w2p = pad2(w2, H1, H2).astype(jnp.bfloat16)        # zero rows for padded h1 lanes
    b2p = pad2(b2, 1, H2).astype(jnp.float32)
    w3r = pad2(w3.T, 1, H2).astype(jnp.bfloat16)       # (300, 1) -> (1, H2) row
    b3p = b3.reshape(1, 1).astype(jnp.float32)
    return (w1p, b1p, w2p, b2p, w3r, b3p)


def _pick_tile_b(batch):
    # Small batches: one tile covering the whole batch (rounded to sublanes).
    if batch <= 256:
        return _round_up(max(batch, 1), 16)
    # Large batches: tiles up to 1024 rows to amortize per-grid-step overhead,
    # but always >= 2 grid steps so the "parallel" batch axis can use both
    # TensorCores on v7x.
    return min(1024, _round_up(_cdiv(batch, 2), 256))


def critic_forward(x, u, packed):
    """x: (B, state_dim), u: (B, action_dim) -> (B, 1) float32 Q-values."""
    w1, b1, w2, b2, w3r, b3 = packed
    k_in = w1.shape[0]
    B = x.shape[0]
    sa = x.shape[1] + u.shape[1]

    tile_b = _pick_tile_b(B)
    b_pad = _round_up(B, tile_b)
    num_tiles = b_pad // tile_b

    # Single packed [x|u] bf16 input (one layer-1 matmul); pad only if needed.
    # NOTE: tile_b (and hence the compiled kernel) depends on B; in an RL loop
    # with a fixed replay-batch size this compiles exactly once.
    xu = jnp.concatenate([x, u], axis=1).astype(jnp.bfloat16)
    if b_pad != B or k_in != sa:
        xu = jnp.pad(xu, ((0, b_pad - B), (0, k_in - sa)))

    # Weights/biases stay VMEM-resident (constant index_map), single-buffered.
    def resident(shape):
        return pl.BlockSpec(shape, lambda i: (0, 0),
                            pipeline_mode=pl.Buffered(1))

    out = pl.pallas_call(
        critic_kernel,
        out_shape=jax.ShapeDtypeStruct((b_pad, 1), jnp.float32),
        grid=(num_tiles,),
        in_specs=[
            pl.BlockSpec((tile_b, k_in), lambda i: (i, 0)),      # [x|u] tile (bf16)
            resident((k_in, H1)),                                # W1 (bf16)
            resident((1, H1)),                                   # b1 (f32)
            resident((H1, H2)),                                  # W2 (bf16)
            resident((1, H2)),                                   # b2 (f32)
            resident((1, H2)),                                   # W3 row (bf16)
            pl.BlockSpec(memory_space=pltpu.MemorySpace.SMEM),   # b3 scalar (f32)
        ],
        out_specs=pl.BlockSpec((tile_b, 1), lambda i: (i, 0)),
        compiler_params=pltpu.CompilerParams(
            dimension_semantics=("parallel",)),
    )(xu, w1, b1, w2, b2, w3r, b3)
    return out[:B]


if __name__ == "__main__":
    key = jax.random.PRNGKey(0)
    state_dim, action_dim, batch = 16, 4, 2

    params = init_critic_params(key, state_dim, action_dim)
    packed = pack_critic_params(params)

    # Reference: plain-JAX f32 of the original (unpadded) math.
    def ref_fwd(xr, ur):
        w1, b1, w2, b2, w3, b3 = params
        h = jnp.concatenate([xr, ur], axis=1)
        h = jnp.maximum(h @ w1 + b1, 0.0)
        h = jnp.maximum(h @ w2 + b2, 0.0)
        return h @ w3 + b3

    kx, ku = jax.random.split(jax.random.fold_in(key, 123))
    x = jax.random.normal(kx, (batch, state_dim), jnp.float32)
    u = jax.random.normal(ku, (batch, action_dim), jnp.float32)

    q = critic_forward(x, u, packed)
    jax.block_until_ready(q)
    assert q.shape == (batch, 1)
    assert jnp.allclose(q, ref_fwd(x, u), atol=3e-2, rtol=3e-2), (q, ref_fwd(x, u))

    # Also exercise the multi-tile (>=2 grid steps, 512-row tiles) batch path.
    kx2, ku2 = jax.random.split(jax.random.fold_in(key, 456))
    xb = jax.random.normal(kx2, (600, state_dim), jnp.float32)
    ub = jax.random.normal(ku2, (600, action_dim), jnp.float32)
    qb = critic_forward(xb, ub, packed)
    jax.block_until_ready(qb)
    assert qb.shape == (600, 1)
    assert jnp.allclose(qb, ref_fwd(xb, ub), atol=3e-2, rtol=3e-2)

    print("KERNEL_OK")
</pallas_src>

<mosaic_0001>
module attributes {stable_mosaic.version = 11 : i64} {
  func.func @critic_kernel(%arg0: i32, %arg1: memref<16x24xbf16, #tpu.memory_space<vmem>>, %arg2: memref<24x512xbf16, #tpu.memory_space<vmem>>, %arg3: memref<1x512xf32, #tpu.memory_space<vmem>>, %arg4: memref<512x384xbf16, #tpu.memory_space<vmem>>, %arg5: memref<1x384xf32, #tpu.memory_space<vmem>>, %arg6: memref<1x384xbf16, #tpu.memory_space<vmem>>, %arg7: memref<1x1xf32, #tpu.memory_space<smem>>, %arg8: memref<16x1xf32, #tpu.memory_space<vmem>>) attributes {dimension_semantics = [#tpu.dimension_semantics<parallel>], iteration_bounds = array<i64: 1>, scalar_prefetch = 0 : i64, scratch_operands = 0 : i64, tpu.core_type = #tpu.core_type<tc>, window_params = [{transform_indices = @transform_0, window_bounds = array<i64: 16, 24>}, {pipeline_mode = #tpu.pipeline_mode<synchronous>, transform_indices = @transform_1, window_bounds = array<i64: 24, 512>}, {pipeline_mode = #tpu.pipeline_mode<synchronous>, transform_indices = @transform_2, window_bounds = array<i64: 1, 512>}, {pipeline_mode = #tpu.pipeline_mode<synchronous>, transform_indices = @transform_3, window_bounds = array<i64: 512, 384>}, {pipeline_mode = #tpu.pipeline_mode<synchronous>, transform_indices = @transform_4, window_bounds = array<i64: 1, 384>}, {pipeline_mode = #tpu.pipeline_mode<synchronous>, transform_indices = @transform_5, window_bounds = array<i64: 1, 384>}, {transform_indices = @transform_6, window_bounds = array<i64: 1, 1>}, {transform_indices = @transform_7, window_bounds = array<i64: 16, 1>}]} {
    %c0 = arith.constant 0 : index
    %c0_0 = arith.constant 0 : index
    %0 = vector.load %arg1[%c0, %c0_0] : memref<16x24xbf16, #tpu.memory_space<vmem>>, vector<16x24xbf16>
    %c0_1 = arith.constant 0 : index
    %c0_2 = arith.constant 0 : index
    %1 = vector.load %arg2[%c0_1, %c0_2] : memref<24x512xbf16, #tpu.memory_space<vmem>>, vector<24x512xbf16>
    %cst = arith.constant dense<0.000000e+00> : vector<16x512xf32>
    %2 = tpu.matmul %0, %1, %cst {dimension_numbers = #tpu.dot_dimension_numbers<[1], [0], [0], [1], [0, 0, 1, 1], [], []>} : vector<16x24xbf16>, vector<24x512xbf16>, vector<16x512xf32> -> vector<16x512xf32>
    %c0_3 = arith.constant 0 : index
    %c0_4 = arith.constant 0 : index
    %3 = vector.load %arg3[%c0_3, %c0_4] : memref<1x512xf32, #tpu.memory_space<vmem>>, vector<1x512xf32>
    %4 = vector.broadcast %3 : vector<1x512xf32> to vector<16x512xf32>
    %5 = arith.addf %2, %4 : vector<16x512xf32>
    %cst_5 = arith.constant 0.000000e+00 : f32
    %6 = vector.broadcast %cst_5 : f32 to vector<16x512xf32>
    %7 = arith.maximumf %5, %6 : vector<16x512xf32>
    %8 = arith.truncf %7 : vector<16x512xf32> to vector<16x512xbf16>
    %c0_6 = arith.constant 0 : index
    %c0_7 = arith.constant 0 : index
    %9 = vector.load %arg4[%c0_6, %c0_7] : memref<512x384xbf16, #tpu.memory_space<vmem>>, vector<512x384xbf16>
    %cst_8 = arith.constant dense<0.000000e+00> : vector<16x384xf32>
    %10 = tpu.matmul %8, %9, %cst_8 {dimension_numbers = #tpu.dot_dimension_numbers<[1], [0], [0], [1], [0, 0, 1, 1], [], []>} : vector<16x512xbf16>, vector<512x384xbf16>, vector<16x384xf32> -> vector<16x384xf32>
    %c0_9 = arith.constant 0 : index
    %c0_10 = arith.constant 0 : index
    %11 = vector.load %arg5[%c0_9, %c0_10] : memref<1x384xf32, #tpu.memory_space<vmem>>, vector<1x384xf32>
    %12 = vector.broadcast %11 : vector<1x384xf32> to vector<16x384xf32>
    %13 = arith.addf %10, %12 : vector<16x384xf32>
    %cst_11 = arith.constant 0.000000e+00 : f32
    %14 = vector.broadcast %cst_11 : f32 to vector<16x384xf32>
    %15 = arith.maximumf %13, %14 : vector<16x384xf32>
    %c0_12 = arith.constant 0 : index
    %c0_13 = arith.constant 0 : index
    %16 = vector.load %arg6[%c0_12, %c0_13] : memref<1x384xbf16, #tpu.memory_space<vmem>>, vector<1x384xbf16>
    %17 = arith.extf %16 : vector<1x384xbf16> to vector<1x384xf32>
    %18 = vector.broadcast %17 : vector<1x384xf32> to vector<16x384xf32>
    %19 = arith.mulf %15, %18 : vector<16x384xf32>
    %cst_14 = arith.constant dense<0.000000e+00> : vector<16xf32>
    %20 = vector.multi_reduction <add>, %19, %cst_14 [1] : vector<16x384xf32> to vector<16xf32>
    %21 = vector.shape_cast %20 : vector<16xf32> to vector<16x1xf32>
    %c0_15 = arith.constant 0 : index
    %c0_16 = arith.constant 0 : index
    %22 = memref.load %arg7[%c0_15, %c0_16] : memref<1x1xf32, #tpu.memory_space<smem>>
    %23 = vector.broadcast %22 : f32 to vector<16x1xf32>
    %24 = arith.addf %21, %23 : vector<16x1xf32>
    %c0_17 = arith.constant 0 : index
    %c0_18 = arith.constant 0 : index
    %25 = vector.load %arg8[%c0_17, %c0_18] : memref<16x1xf32, #tpu.memory_space<vmem>>, vector<16x1xf32>
    tpu.vector_store %arg8[%c0_17, %c0_18], %24 {strides = array<i32>} : memref<16x1xf32, #tpu.memory_space<vmem>>, vector<16x1xf32>,
    return
  }
  func.func @transform_0(%arg0: i32) -> (i32, i32) {
    %c0_i32 = arith.constant 0 : i32
    %c0_i32_0 = arith.constant 0 : i32
    return %arg0, %c0_i32 : i32, i32
  }
  func.func @transform_1(%arg0: i32) -> (i32, i32) {
    %c0_i32 = arith.constant 0 : i32
    %c0_i32_0 = arith.constant 0 : i32
    %c0_i32_1 = arith.constant 0 : i32
    return %c0_i32, %c0_i32_0 : i32, i32
  }
  func.func @transform_2(%arg0: i32) -> (i32, i32) {
    %c0_i32 = arith.constant 0 : i32
    %c0_i32_0 = arith.constant 0 : i32
    %c0_i32_1 = arith.constant 0 : i32
    return %c0_i32, %c0_i32_0 : i32, i32
  }
  func.func @transform_3(%arg0: i32) -> (i32, i32) {
    %c0_i32 = arith.constant 0 : i32
    %c0_i32_0 = arith.constant 0 : i32
    %c0_i32_1 = arith.constant 0 : i32
    return %c0_i32, %c0_i32_0 : i32, i32
  }
  func.func @transform_4(%arg0: i32) -> (i32, i32) {
    %c0_i32 = arith.constant 0 : i32
    %c0_i32_0 = arith.constant 0 : i32
    %c0_i32_1 = arith.constant 0 : i32
    return %c0_i32, %c0_i32_0 : i32, i32
  }
  func.func @transform_5(%arg0: i32) -> (i32, i32) {
    %c0_i32 = arith.constant 0 : i32
    %c0_i32_0 = arith.constant 0 : i32
    %c0_i32_1 = arith.constant 0 : i32
    return %c0_i32, %c0_i32_0 : i32, i32
  }
  func.func @transform_6(%arg0: i32) -> (i32, i32) {
    %c0_i32 = arith.constant 0 : i32
    %c0_i32_0 = arith.constant 0 : i32
    %c0_i32_1 = arith.constant 0 : i32
    return %c0_i32, %c0_i32_0 : i32, i32
  }
  func.func @transform_7(%arg0: i32) -> (i32, i32) {
    %c0_i32 = arith.constant 0 : i32
    %c0_i32_0 = arith.constant 0 : i32
    return %arg0, %c0_i32 : i32, i32
  }
}

</mosaic_0001>

<bundles_post_ra>
// kernel: tpu_custom_call.1
= control target key start
LH: loop header
LB: loop body
LE: loop exit
PB: predicated region body
PF: predicated region fallthrough
CT: control target
= control target key end

     0   :  { %13 = vsyncpa [#allocation4], 0  ;;  %s1815_s0 = inlined_call_operand.hbm [shape: bf16[16,24], index: 0, kind: input, shape index: {}]   ;;  %s1816_s1 = inlined_call_operand.hbm [shape: bf16[24,512], index: 1, kind: input, shape index: {}]   ;;  %s1817_s2 = inlined_call_operand.hbm [shape: f32[1,512], index: 2, kind: input, shape index: {}]   ;;  %s1818_s3 = inlined_call_operand.hbm [shape: bf16[512,384], index: 3, kind: input, shape index: {}]   ;;  %s1819_s4 = inlined_call_operand.vmem [shape: f32[1,384], index: 4, kind: input, shape index: {}]   ;;  %s1820_s5 = inlined_call_operand.vmem [shape: bf16[1,384], index: 5, kind: input, shape index: {}]   ;;  %s1821_s6 = inlined_call_operand.<no memory space> [shape: f32[1,1], index: 6, kind: input, shape index: {}]   ;;  %s1822_s7 = inlined_call_operand.vmem [shape: f32[16,1], index: 7, kind: output, shape index: {}]  }
   0x1   :  { %14 = vsyncpa [#allocation6], 0  ;;  %s33_s26 = sshll.u32 %s1816_s1, 4  ;;  %s34_s26 = int_to_ptr.hbm [resolvable:$true] %s33_s26 }
   0x2   :  { %15 = vsyncpa [#allocation9], 0  ;;  %s1710_s27 = smov [#allocation5]   ;;  %s20_s8 = sshll.u32 %s1815_s0, 4  ;;  %s21_s8 = int_to_ptr.hbm [resolvable:$true] %s20_s8 }
   0x3   :  { %s35_s28 = sshll.u32 %s1710_s27, 4  ;;  %s1711_s9 = smov 256   ;;  %s36_s28 = int_to_ptr.vmem [resolvable:$true] %s35_s28 }
   0x4   :  { %s1712_s10 = smov 16   ;;  %s1713_s11 = smov [#allocation3]  }
   0x5   :  { %41 = dma.hbm_to_vmem [thread:$0]  %s34_s26, 768, %s36_s28, [#allocation6], %s1711_s9, %s1711_s9, %s1712_s10  }
   0x6   :  { %s22_s12 = sshll.u32 %s1713_s11, 4  ;;  %s1714_s13 = smov 64   ;;  %s23_s12 = int_to_ptr.vmem [resolvable:$true] %s22_s12 }
   0x7   :  { %s1715_s14 = smov 4   ;;  %s47_s16 = sshll.u32 %s1817_s2, 4  ;;  %s48_s16 = int_to_ptr.hbm [resolvable:$true] %s47_s16 }
   0x8   :  { %28 = dma.hbm_to_vmem [thread:$0]  %s21_s8, 128, %s23_s12, [#allocation4], %s1714_s13, %s1714_s13, %s1715_s14  }
   0x9   :  { %s1716_s17 = smov [#allocation7]   ;;  %s57_s20 = sshll.u32 %s1818_s3, 4  ;;  %s58_s20 = int_to_ptr.hbm [resolvable:$true] %s57_s20 }
   0xa   :  { %s49_s18 = sshll.u32 %s1716_s17, 4  ;;  %s1717_s21 = smov [#allocation8]   ;;  %s50_s18 = int_to_ptr.vmem [resolvable:$true] %s49_s18 }
   0xb   :  { %52 = dma.hbm_to_vmem [thread:$0]  %s48_s16, 64, %s50_s18, [#allocation6]  }
   0xc   :  { %s59_s22 = sshll.u32 %s1717_s21, 4  ;;  %s1718_s23 = smov 192   ;;  %s60_s22 = int_to_ptr.vmem [resolvable:$true] %s59_s22 }
   0xd   :  { %s1719_s24 = smov 12  }
   0xe   :  { %65 = dma.hbm_to_vmem [thread:$0]  %s58_s20, 12288, %s60_s22, [#allocation9], %s1718_s23, %s1718_s23, %s1719_s24  }
   0xf   :  { %1704 = dma.done.wait [#allocation4], 128  }
  0x10   :  { %1705 = vsyncadd [#allocation4], 4294967168 }
  0x11   :  { %1706 = dma.done.wait [#allocation6], 832  }
  0x12   :  { %1707 = vsyncadd [#allocation6], 4294966464 }
  0x13   :  { %1708 = dma.done.wait [#allocation9], 12288  }
  0x14   :  { %1709 = vsyncadd [#allocation9], 4294955008  ;;  %v95_v0 = vld [vmem:[#allocation5 + $0x20] sm:$0xff]  ;;  %vm146_vm0 = vcmask 1043456   ;;  %v96_v1 = vld [vmem:[#allocation5 + $0x28] sm:$0xff]  ;;  %vm142_vm1 = vcmask 195584  }
  0x15   :  { %v126_v2 = vunpack.c.l.b16 %v95_v0  ;;  %v127_v3 = vunpack.c.h.b16 %v95_v0  ;;  %v128_v4 = vunpack.c.l.b16 %v96_v1  ;;  %v129_v5 = vunpack.c.h.b16 %v96_v1  ;;  %v1095_v6 = vld [vmem:[#allocation5] sm:$0xf]  ;;  %v1500_v7 = vld [vmem:[#allocation5 + $0xc] sm:$0xf0]  ;;  %v1498_v8 = vld [vmem:[#allocation5 + $0x4] sm:$0xf] }
  0x16   :  { %v1097_v9 = vld [vmem:[#allocation5 + $0x10] sm:$0xf0]  ;;  %v1103_v10 = vld [vmem:[#allocation5 + $0x8] sm:$0xf]  ;;  %v1501_v15 = vld [vmem:[#allocation5 + $0x14] sm:$0xf0]  ;;  %v1096_v26 = vor.u32 %v1500_v7, %v1095_v6 }
  0x17   :  { %v134_v11 = vpack.c.b16 %v126_v2, %v126_v2  ;;  %v135_v12 = vpack.c.b16 %v127_v3, %v127_v3  ;;  %v136_v13 = vpack.c.b16 %v128_v4, %v128_v4  ;;  %v137_v14 = vpack.c.b16 %v129_v5, %v129_v5  ;;  %v1499_v16 = vld [vmem:[#allocation5 + $0xc] sm:$0xf]  ;;  %v1105_v17 = vld [vmem:[#allocation5 + $0x18] sm:$0xf0]  ;;  %v1524_v19 = vld [vmem:[#allocation8 + $0xb0] sm:$0xf0] }
  0x18   :  { %v1199_v18 = vld [vmem:[#allocation8 + $0xa8] sm:$0xf]  ;;  %v1548_v25 = vld [vmem:[#allocation8 + $0x170] sm:$0xf0]  ;;  %v1100_v27 = vor.u32 %v1498_v8, %v1097_v9  ;;  %v1104_v28 = vor.u32 %v1501_v15, %v1103_v10  ;;  %v1108_v29 = vor.u32 %v1499_v16, %v1105_v17  ;;  %v1187_v31 = vld [vmem:[#allocation8 + $0x90] sm:$0xf] }
  0x19   :  { %v1295_v20 = vld [vmem:[#allocation8 + $0x168] sm:$0xf]  ;;  %v148_v21 = vsel %vm146_vm0, %v134_v11, 0  ;;  %v151_v22 = vsel %vm146_vm0, %v135_v12, 0  ;;  %v154_v23 = vsel %vm146_vm0, %v136_v13, 0  ;;  %v157_v24 = vsel %vm146_vm0, %v137_v14, 0 }
  0x1a   :  { %165 = vmatpush.bf16.msra.mxu0 %v148_v21  ;;  %179 = vmatpush.bf16.msra.mxu1 %v151_v22  ;;  %v1497_v30 = vld [vmem:[#allocation3] sm:$0xff]  ;;  %v1200_v33 = vor.u32 %v1524_v19, %v1199_v18  ;;  %v1296_v34 = vor.u32 %v1548_v25, %v1295_v20  ;;  %v1572_v35 = vld [vmem:[#allocation8 + $0x230] sm:$0xf0]  ;;  %v1521_v38 = vld [vmem:[#allocation8 + $0x98] sm:$0xf0]  ;;  %vm1079_vm2 = vcmask 7168  }
  0x1b   :  { %193 = vmatpush.bf16.msra.mxu2 %v154_v23  ;;  %207 = vmatpush.bf16.msra.mxu3 %v157_v24  ;;  %v1391_v32 = vld [vmem:[#allocation8 + $0x228] sm:$0xf]  ;;  %v1596_v37 = vld [vmem:[#allocation8 + $0x2f0] sm:$0xf0]  ;;  %v1283_v39 = vld [vmem:[#allocation8 + $0x150] sm:$0xf]  ;;  %v1188_v45 = vor.u32 %v1521_v38, %v1187_v31 }
  0x1c   :  { %v1487_v36 = vld [vmem:[#allocation8 + $0x2e8] sm:$0xf]  ;;  %v1545_v40 = vld [vmem:[#allocation8 + $0x158] sm:$0xf0]  ;;  %v1392_v41 = vor.u32 %v1572_v35, %v1391_v32  ;;  %v1175_v43 = vld [vmem:[#allocation8 + $0x78] sm:$0xf] }
  0x1d   :  { %v1488_v42 = vor.u32 %v1596_v37, %v1487_v36  ;;  %v1379_v44 = vld [vmem:[#allocation8 + $0x210] sm:$0xf]  ;;  %v1284_v46 = vor.u32 %v1545_v40, %v1283_v39  ;;  %v1569_v47 = vld [vmem:[#allocation8 + $0x218] sm:$0xf0]  ;;  %v1518_v50 = vld [vmem:[#allocation8 + $0x80] sm:$0xf0] }
  0x1e   :  { %166 = vmatpush.bf16.msra.mxu0 %v1096_v26  ;;  %180 = vmatpush.bf16.msra.mxu1 %v1100_v27  ;;  %v1475_v48 = vld [vmem:[#allocation8 + $0x2d0] sm:$0xf]  ;;  %v1593_v49 = vld [vmem:[#allocation8 + $0x2d8] sm:$0xf0]  ;;  %v1271_v51 = vld [vmem:[#allocation8 + $0x138] sm:$0xf]  ;;  %v1380_v53 = vor.u32 %v1569_v47, %v1379_v44  ;;  %v1176_v57 = vor.u32 %v1518_v50, %v1175_v43 }
  0x1f   :  { %194 = vmatpush.bf16.msra.mxu2 %v1104_v28  ;;  %208 = vmatpush.bf16.msra.mxu3 %v1108_v29  ;;  %v1542_v52 = vld [vmem:[#allocation8 + $0x140] sm:$0xf0]  ;;  %v1476_v54 = vor.u32 %v1593_v49, %v1475_v48  ;;  %v1163_v55 = vld [vmem:[#allocation8 + $0x60] sm:$0xf]  ;;  %v1367_v56 = vld [vmem:[#allocation8 + $0x1f8] sm:$0xf] }
  0x20   :  { %v1272_v58 = vor.u32 %v1542_v52, %v1271_v51  ;;  %v1566_v59 = vld [vmem:[#allocation8 + $0x200] sm:$0xf0]  ;;  %v1463_v60 = vld [vmem:[#allocation8 + $0x2b8] sm:$0xf]  ;;  %v1515_v62 = vld [vmem:[#allocation8 + $0x68] sm:$0xf0] }
  0x21   :  { %1109 = vmatmul.msk.bf16.vlgmr.msra.gmra.mxu0 %vm142_vm1, %v1497_v30  ;;  %1110 = vmatmul.msk.bf16.vlgmr.msra.gmra.mxu1 %vm142_vm1, %v1497_v30  ;;  %v1590_v61 = vld [vmem:[#allocation8 + $0x2c0] sm:$0xf0]  ;;  %v1259_v63 = vld [vmem:[#allocation8 + $0x120] sm:$0xf]  ;;  %v1539_v0 = vld [vmem:[#allocation8 + $0x128] sm:$0xf0]  ;;  %v1368_v1 = vor.u32 %v1566_v59, %v1367_v56  ;;  %v1164_v5 = vor.u32 %v1515_v62, %v1163_v55 }
  0x22   :  { %875 = vmatpush.bf16.msrb.mxu0 %v1200_v33  ;;  %889 = vmatpush.bf16.msrb.mxu1 %v1296_v34  ;;  %v1464_v2 = vor.u32 %v1590_v61, %v1463_v60  ;;  %v1151_v3 = vld [vmem:[#allocation8 + $0x48] sm:$0xf]  ;;  %v1355_v4 = vld [vmem:[#allocation8 + $0x1e0] sm:$0xf]  ;;  %v1260_v6 = vor.u32 %v1539_v0, %v1259_v63  ;;  %v1563_v7 = vld [vmem:[#allocation8 + $0x1e8] sm:$0xf0] }
  0x23   :  { %1111 = vmatmul.msk.bf16.vlgmr.msra.gmra.mxu2 %vm142_vm1, %v1497_v30  ;;  %1112 = vmatmul.msk.bf16.vlgmr.msra.gmra.mxu3 %vm142_vm1, %v1497_v30  ;;  %v1451_v8 = vld [vmem:[#allocation8 + $0x2a0] sm:$0xf]  ;;  %v1587_v9 = vld [vmem:[#allocation8 + $0x2a8] sm:$0xf0]  ;;  %v1512_v10 = vld [vmem:[#allocation8 + $0x50] sm:$0xf0]  ;;  %v1356_v13 = vor.u32 %v1563_v7, %v1355_v4 }
  0x24   :  { %903 = vmatpush.bf16.msrb.mxu2 %v1392_v41  ;;  %917 = vmatpush.bf16.msrb.mxu3 %v1488_v42  ;;  %v1247_v11 = vld [vmem:[#allocation8 + $0x108] sm:$0xf]  ;;  %v1536_v12 = vld [vmem:[#allocation8 + $0x110] sm:$0xf0]  ;;  %v1452_v14 = vor.u32 %v1587_v9, %v1451_v8  ;;  %v1139_v15 = vld [vmem:[#allocation8 + $0x30] sm:$0xf]  ;;  %v1152_v17 = vor.u32 %v1512_v10, %v1151_v3 }
  0x25   :  { %v1343_v16 = vld [vmem:[#allocation8 + $0x1c8] sm:$0xf]  ;;  %v1248_v18 = vor.u32 %v1536_v12, %v1247_v11  ;;  %v1560_v19 = vld [vmem:[#allocation8 + $0x1d0] sm:$0xf0]  ;;  %v1509_v22 = vld [vmem:[#allocation8 + $0x38] sm:$0xf0] }
  0x26   :  { %876 = vmatpush.bf16.msrb.mxu0 %v1188_v45  ;;  %890 = vmatpush.bf16.msrb.mxu1 %v1284_v46  ;;  %v1439_v20 = vld [vmem:[#allocation8 + $0x288] sm:$0xf]  ;;  %v1584_v21 = vld [vmem:[#allocation8 + $0x290] sm:$0xf0]  ;;  %v1235_v23 = vld [vmem:[#allocation8 + $0xf0] sm:$0xf]  ;;  %v1344_v25 = vor.u32 %v1560_v19, %v1343_v16  ;;  %v1140_v29 = vor.u32 %v1509_v22, %v1139_v15 }
  0x27   :  { %v1533_v24 = vld [vmem:[#allocation8 + $0xf8] sm:$0xf0]  ;;  %v1440_v26 = vor.u32 %v1584_v21, %v1439_v20  ;;  %v1127_v27 = vld [vmem:[#allocation8 + $0x18] sm:$0xf]  ;;  %v1331_v28 = vld [vmem:[#allocation8 + $0x1b0] sm:$0xf] }
  0x28   :  { %904 = vmatpush.bf16.msrb.mxu2 %v1380_v53  ;;  %918 = vmatpush.bf16.msrb.mxu3 %v1476_v54  ;;  %v1236_v30 = vor.u32 %v1533_v24, %v1235_v23  ;;  %v1557_v31 = vld [vmem:[#allocation8 + $0x1b8] sm:$0xf0]  ;;  %v1427_v32 = vld [vmem:[#allocation8 + $0x270] sm:$0xf]  ;;  %v1506_v34 = vld [vmem:[#allocation8 + $0x20] sm:$0xf0] }
  0x29   :  { %v1581_v33 = vld [vmem:[#allocation8 + $0x278] sm:$0xf0]  ;;  %v1223_v35 = vld [vmem:[#allocation8 + $0xd8] sm:$0xf]  ;;  %v1530_v36 = vld [vmem:[#allocation8 + $0xe0] sm:$0xf0]  ;;  %v1332_v37 = vor.u32 %v1557_v31, %v1331_v28  ;;  %v1128_v42 = vor.u32 %v1506_v34, %v1127_v27 }
  0x2a   :  { %877 = vmatpush.bf16.msrb.mxu0 %v1176_v57  ;;  %891 = vmatpush.bf16.msrb.mxu1 %v1272_v58  ;;  %v1428_v38 = vor.u32 %v1581_v33, %v1427_v32  ;;  %v1115_v39 = vld [vmem:[#allocation8] sm:$0xf]  ;;  %v1503_v40 = vld [vmem:[#allocation8 + $0x8] sm:$0xf0]  ;;  %v1319_v41 = vld [vmem:[#allocation8 + $0x198] sm:$0xf]  ;;  %v1224_v43 = vor.u32 %v1530_v36, %v1223_v35 }
  0x2b   :  { %v1554_v44 = vld [vmem:[#allocation8 + $0x1a0] sm:$0xf0]  ;;  %v1415_v45 = vld [vmem:[#allocation8 + $0x258] sm:$0xf]  ;;  %v1211_v47 = vld [vmem:[#allocation8 + $0xc0] sm:$0xf]  ;;  %v1116_v57 = vor.u32 %v1503_v40, %v1115_v39 }
  0x2c   :  { %905 = vmatpush.bf16.msrb.mxu2 %v1368_v1  ;;  %919 = vmatpush.bf16.msrb.mxu3 %v1464_v2  ;;  %v1578_v46 = vld [vmem:[#allocation8 + $0x260] sm:$0xf0]  ;;  %v1527_v48 = vld [vmem:[#allocation8 + $0xc8] sm:$0xf0]  ;;  %v1201_v50 = vld [vmem:[#allocation8 + $0xb4] sm:$0xf0]  ;;  %v1320_v53 = vor.u32 %v1554_v44, %v1319_v41 }
  0x2d   :  { %v1523_v49 = vld [vmem:[#allocation8 + $0xac] sm:$0xf]  ;;  %v1297_v52 = vld [vmem:[#allocation8 + $0x174] sm:$0xf0]  ;;  %v1416_v54 = vor.u32 %v1578_v46, %v1415_v45  ;;  %v1307_v55 = vld [vmem:[#allocation8 + $0x180] sm:$0xf]  ;;  %v1212_v58 = vor.u32 %v1527_v48, %v1211_v47 }
  0x2e   :  { %878 = vmatpush.bf16.msrb.mxu0 %v1164_v5  ;;  %892 = vmatpush.bf16.msrb.mxu1 %v1260_v6  ;;  %v1547_v51 = vld [vmem:[#allocation8 + $0x16c] sm:$0xf]  ;;  %v1520_v59 = vld [vmem:[#allocation8 + $0x94] sm:$0xf]  ;;  %v1403_v60 = vld [vmem:[#allocation8 + $0x240] sm:$0xf]  ;;  %v1204_v63 = vor.u32 %v1523_v49, %v1201_v50 }
  0x2f   :  { %v1551_v56 = vld [vmem:[#allocation8 + $0x188] sm:$0xf0]  ;;  %v1300_v0 = vor.u32 %v1547_v51, %v1297_v52  ;;  %v1393_v1 = vld [vmem:[#allocation8 + $0x234] sm:$0xf0]  ;;  %v1189_v4 = vld [vmem:[#allocation8 + $0x9c] sm:$0xf0] }
  0x30   :  { %906 = vmatpush.bf16.msrb.mxu2 %v1356_v13  ;;  %920 = vmatpush.bf16.msrb.mxu3 %v1452_v14  ;;  %v1575_v61 = vld [vmem:[#allocation8 + $0x248] sm:$0xf0]  ;;  %v1489_v3 = vld [vmem:[#allocation8 + $0x2f4] sm:$0xf0]  ;;  %v1544_v5 = vld [vmem:[#allocation8 + $0x154] sm:$0xf]  ;;  %v1308_v7 = vor.u32 %v1551_v56, %v1307_v55  ;;  %v1192_v13 = vor.u32 %v1520_v59, %v1189_v4 }
  0x31   :  { %v1571_v62 = vld [vmem:[#allocation8 + $0x22c] sm:$0xf]  ;;  %v1285_v6 = vld [vmem:[#allocation8 + $0x15c] sm:$0xf0]  ;;  %v1404_v8 = vor.u32 %v1575_v61, %v1403_v60  ;;  %v1517_v11 = vld [vmem:[#allocation8 + $0x7c] sm:$0xf] }
  0x32   :  { %879 = vmatpush.bf16.msrb.mxu0 %v1152_v17  ;;  %893 = vmatpush.bf16.msrb.mxu1 %v1248_v18  ;;  %v1595_v2 = vld [vmem:[#allocation8 + $0x2ec] sm:$0xf]  ;;  %v1396_v9 = vor.u32 %v1571_v62, %v1393_v1  ;;  %v1568_v12 = vld [vmem:[#allocation8 + $0x214] sm:$0xf]  ;;  %v1288_v14 = vor.u32 %v1544_v5, %v1285_v6  ;;  %v1381_v15 = vld [vmem:[#allocation8 + $0x21c] sm:$0xf0] }
  0x33   :  { %v1492_v10 = vor.u32 %v1595_v2, %v1489_v3  ;;  %v1592_v16 = vld [vmem:[#allocation8 + $0x2d4] sm:$0xf]  ;;  %v1477_v17 = vld [vmem:[#allocation8 + $0x2dc] sm:$0xf0]  ;;  %v1177_v18 = vld [vmem:[#allocation8 + $0x84] sm:$0xf0]  ;;  %v1384_v21 = vor.u32 %v1568_v12, %v1381_v15 }
  0x34   :  { %907 = vmatpush.bf16.msrb.mxu2 %v1344_v25  ;;  %921 = vmatpush.bf16.msrb.mxu3 %v1440_v26  ;;  %v1541_v19 = vld [vmem:[#allocation8 + $0x13c] sm:$0xf]  ;;  %v1273_v20 = vld [vmem:[#allocation8 + $0x144] sm:$0xf0]  ;;  %v1480_v22 = vor.u32 %v1592_v16, %v1477_v17  ;;  %v1180_v23 = vor.u32 %v1517_v11, %v1177_v18  ;;  %v1514_v25 = vld [vmem:[#allocation8 + $0x64] sm:$0xf] }
  0x35   :  { %v1276_v24 = vor.u32 %v1541_v19, %v1273_v20  ;;  %v1165_v26 = vld [vmem:[#allocation8 + $0x6c] sm:$0xf0]  ;;  %v1538_v27 = vld [vmem:[#allocation8 + $0x124] sm:$0xf]  ;;  %v1565_v31 = vld [vmem:[#allocation8 + $0x1fc] sm:$0xf] }
  0x36   :  { %880 = vmatpush.bf16.msrb.mxu0 %v1140_v29  ;;  %894 = vmatpush.bf16.msrb.mxu1 %v1236_v30  ;;  %v1261_v28 = vld [vmem:[#allocation8 + $0x12c] sm:$0xf0]  ;;  %v1168_v29 = vor.u32 %v1514_v25, %v1165_v26  ;;  %v1369_v32 = vld [vmem:[#allocation8 + $0x204] sm:$0xf0]  ;;  %v1589_v33 = vld [vmem:[#allocation8 + $0x2bc] sm:$0xf] }
  0x37   :  { %v1264_v30 = vor.u32 %v1538_v27, %v1261_v28  ;;  %v1372_v34 = vor.u32 %v1565_v31, %v1369_v32  ;;  %v1465_v35 = vld [vmem:[#allocation8 + $0x2c4] sm:$0xf0]  ;;  %v1535_v39 = vld [vmem:[#allocation8 + $0x10c] sm:$0xf]  ;;  %v1249_v41 = vld [vmem:[#allocation8 + $0x114] sm:$0xf0] }
  0x38   :  { %908 = vmatpush.bf16.msrb.mxu2 %v1332_v37  ;;  %922 = vmatpush.bf16.msrb.mxu3 %v1428_v38  ;;  %v1468_v36 = vor.u32 %v1589_v33, %v1465_v35  ;;  %v1511_v37 = vld [vmem:[#allocation8 + $0x4c] sm:$0xf]  ;;  %v1153_v38 = vld [vmem:[#allocation8 + $0x54] sm:$0xf0]  ;;  %v1357_v44 = vld [vmem:[#allocation8 + $0x1ec] sm:$0xf0] }
  0x39   :  { %v1156_v40 = vor.u32 %v1511_v37, %v1153_v38  ;;  %v1586_v46 = vld [vmem:[#allocation8 + $0x2a4] sm:$0xf]  ;;  %v1453_v47 = vld [vmem:[#allocation8 + $0x2ac] sm:$0xf0]  ;;  %v1508_v49 = vld [vmem:[#allocation8 + $0x34] sm:$0xf] }
  0x3a   :  { %881 = vmatpush.bf16.msrb.mxu0 %v1128_v42  ;;  %895 = vmatpush.bf16.msrb.mxu1 %v1224_v43  ;;  %v1252_v42 = vor.u32 %v1535_v39, %v1249_v41  ;;  %v1562_v43 = vld [vmem:[#allocation8 + $0x1e4] sm:$0xf]  ;;  %v1456_v48 = vor.u32 %v1586_v46, %v1453_v47  ;;  %v1141_v50 = vld [vmem:[#allocation8 + $0x3c] sm:$0xf0]  ;;  %v1532_v51 = vld [vmem:[#allocation8 + $0xf4] sm:$0xf] }
  0x3b   :  { %v1360_v45 = vor.u32 %v1562_v43, %v1357_v44  ;;  %v1144_v52 = vor.u32 %v1508_v49, %v1141_v50  ;;  %v1559_v55 = vld [vmem:[#allocation8 + $0x1cc] sm:$0xf]  ;;  %v1345_v56 = vld [vmem:[#allocation8 + $0x1d4] sm:$0xf0]  ;;  %v1505_v61 = vld [vmem:[#allocation8 + $0x1c] sm:$0xf] }
  0x3c   :  { %909 = vmatpush.bf16.msrb.mxu2 %v1320_v53  ;;  %923 = vmatpush.bf16.msrb.mxu3 %v1416_v54  ;;  %v1237_v53 = vld [vmem:[#allocation8 + $0xfc] sm:$0xf0]  ;;  %v1441_v59 = vld [vmem:[#allocation8 + $0x294] sm:$0xf0]  ;;  %v1129_v62 = vld [vmem:[#allocation8 + $0x24] sm:$0xf0] }
  0x3d   :  { %v1240_v54 = vor.u32 %v1532_v51, %v1237_v53  ;;  %v1225_v1 = vld [vmem:[#allocation8 + $0xe4] sm:$0xf0]  ;;  %v1556_v3 = vld [vmem:[#allocation8 + $0x1b4] sm:$0xf]  ;;  %v1333_v4 = vld [vmem:[#allocation8 + $0x1bc] sm:$0xf0] }
  0x3e   :  { %882 = vmatpush.bf16.msrb.mxu0 %v1116_v57  ;;  %896 = vmatpush.bf16.msrb.mxu1 %v1212_v58  ;;  %v1583_v57 = vld [vmem:[#allocation8 + $0x28c] sm:$0xf]  ;;  %v1348_v58 = vor.u32 %v1559_v55, %v1345_v56  ;;  %v1580_v5 = vld [vmem:[#allocation8 + $0x274] sm:$0xf]  ;;  %v1336_v6 = vor.u32 %v1556_v3, %v1333_v4  ;;  %v1526_v11 = vld [vmem:[#allocation8 + $0xc4] sm:$0xf] }
  0x3f   :  { %v1444_v60 = vor.u32 %v1583_v57, %v1441_v59  ;;  %v1553_v15 = vld [vmem:[#allocation8 + $0x19c] sm:$0xf]  ;;  %v1321_v16 = vld [vmem:[#allocation8 + $0x1a4] sm:$0xf0]  ;;  %v1405_v25 = vld [vmem:[#allocation8 + $0x24c] sm:$0xf0] }
  0x40   :  { %910 = vmatpush.bf16.msrb.mxu2 %v1308_v7  ;;  %924 = vmatpush.bf16.msrb.mxu3 %v1404_v8  ;;  %v1429_v7 = vld [vmem:[#allocation8 + $0x27c] sm:$0xf0]  ;;  %v1577_v17 = vld [vmem:[#allocation8 + $0x25c] sm:$0xf]  ;;  %v1417_v18 = vld [vmem:[#allocation8 + $0x264] sm:$0xf0]  ;;  %v1324_v19 = vor.u32 %v1553_v15, %v1321_v16 }
  0x41   :  { %v1432_v8 = vor.u32 %v1580_v5, %v1429_v7  ;;  %v1420_v20 = vor.u32 %v1577_v17, %v1417_v18  ;;  %v97_v27 = vld [vmem:[#allocation7] sm:$0xf]  ;;  %v1207_v38 = vld [vmem:[#allocation8 + $0xb0] sm:$0xf]  ;;  %v1522_v53 = vld [vmem:[#allocation8 + $0xa0] sm:$0xf0] }
  0x42   :  { %931 = vmatpush.bf16.msra.mxu0 %v1204_v63  ;;  %945 = vmatpush.bf16.msra.mxu1 %v1300_v0  ;;  %v1529_v63 = vld [vmem:[#allocation8 + $0xdc] sm:$0xf]  ;;  %v1132_v0 = vor.u32 %v1505_v61, %v1129_v62  ;;  %v100_v31 = vperm.slane %v97_v27, 1  ;;  %v1303_v44 = vld [vmem:[#allocation8 + $0x170] sm:$0xf]  ;;  %v101_v46 = vperm.slane %v97_v27, 2 }
  0x43   :  { %v1228_v2 = vor.u32 %v1529_v63, %v1225_v1  ;;  %v1525_v39 = vld [vmem:[#allocation8 + $0xb8] sm:$0xf0]  ;;  %v102_v47 = vperm.slane %v97_v27, 3  ;;  %v1291_v56 = vld [vmem:[#allocation8 + $0x158] sm:$0xf] }
  0x44   :  { %959 = vmatpush.bf16.msra.mxu2 %v1396_v9  ;;  %973 = vmatpush.bf16.msra.mxu3 %v1492_v10  ;;  %v1502_v9 = vld [vmem:[#allocation8 + $0x4] sm:$0xf]  ;;  %v1117_v10 = vld [vmem:[#allocation8 + $0xc] sm:$0xf0]  ;;  %v1208_v50 = vor.u32 %v1525_v39, %v1207_v38  ;;  %v1597_v5 = vld [vmem:[#allocation8 + $0x2f8] sm:$0xf0] }
  0x45   :  { %v1120_v12 = vor.u32 %v1502_v9, %v1117_v10  ;;  %v1546_v57 = vld [vmem:[#allocation8 + $0x160] sm:$0xf0]  ;;  %v1399_v63 = vld [vmem:[#allocation8 + $0x230] sm:$0xf]  ;;  %v1519_v7 = vld [vmem:[#allocation8 + $0x88] sm:$0xf0] }
  0x46   :  { %932 = vmatpush.bf16.msra.mxu0 %v1192_v13  ;;  %946 = vmatpush.bf16.msra.mxu1 %v1288_v14  ;;  %v1213_v13 = vld [vmem:[#allocation8 + $0xcc] sm:$0xf0]  ;;  %v1292_v4 = vor.u32 %v1546_v57, %v1291_v56  ;;  %v1543_v9 = vld [vmem:[#allocation8 + $0x148] sm:$0xf0]  ;;  %v1387_v17 = vld [vmem:[#allocation8 + $0x218] sm:$0xf] }
  0x47   :  { %v1216_v14 = vor.u32 %v1526_v11, %v1213_v13  ;;  %v1495_v1 = vld [vmem:[#allocation8 + $0x2f0] sm:$0xf]  ;;  %v1570_v18 = vld [vmem:[#allocation8 + $0x220] sm:$0xf0]  ;;  %v1537_v39 = vld [vmem:[#allocation8 + $0x118] sm:$0xf0] }
  0x48   :  { %960 = vmatpush.bf16.msra.mxu2 %v1384_v21  ;;  %974 = vmatpush.bf16.msra.mxu3 %v1480_v22  ;;  %v1550_v21 = vld [vmem:[#allocation8 + $0x184] sm:$0xf]  ;;  %v1309_v22 = vld [vmem:[#allocation8 + $0x18c] sm:$0xf0]  ;;  %v1496_v15 = vor.u32 %v1597_v5, %v1495_v1  ;;  %v1561_v57 = vld [vmem:[#allocation8 + $0x1d8] sm:$0xf0] }
  0x49   :  { %v1255_v38 = vld [vmem:[#allocation8 + $0x110] sm:$0xf]  ;;  %v1531_v1 = vld [vmem:[#allocation8 + $0xe8] sm:$0xf0]  ;;  %v1558_v5 = vld [vmem:[#allocation8 + $0x1c0] sm:$0xf0] }
  0x4a   :  { %933 = vmatpush.bf16.msra.mxu0 %v1180_v23  ;;  %947 = vmatpush.bf16.msra.mxu1 %v1276_v24  ;;  %v1312_v23 = vor.u32 %v1550_v21, %v1309_v22  ;;  %v1574_v24 = vld [vmem:[#allocation8 + $0x244] sm:$0xf]  ;;  %v1483_v22 = vld [vmem:[#allocation8 + $0x2d8] sm:$0xf]  ;;  %v1351_v56 = vld [vmem:[#allocation8 + $0x1d0] sm:$0xf] }
  0x4b   :  { %v1408_v26 = vor.u32 %v1574_v24, %v1405_v25  ;;  %v1171_v24 = vld [vmem:[#allocation8 + $0x68] sm:$0xf]  ;;  %v1516_v25 = vld [vmem:[#allocation8 + $0x70] sm:$0xf0] }
  0x4c   :  { %961 = vmatpush.bf16.msra.mxu2 %v1372_v34  ;;  %975 = vmatpush.bf16.msra.mxu3 %v1468_v36 }
  0x4e   :  { %934 = vmatpush.bf16.msra.mxu0 %v1168_v29  ;;  %948 = vmatpush.bf16.msra.mxu1 %v1264_v30  ;;  %v99_v30 = vperm.slane %v97_v27, 0  ;;  %v1540_v27 = vld [vmem:[#allocation8 + $0x130] sm:$0xf0] }
  0x50   :  { %962 = vmatpush.bf16.msra.mxu2 %v1360_v45  ;;  %976 = vmatpush.bf16.msra.mxu3 %v1456_v48  ;;  %v1549_v45 = vld [vmem:[#allocation8 + $0x178] sm:$0xf0] }
  0x51   :  { %v1304_v51 = vor.u32 %v1549_v45, %v1303_v44  ;;  %v1459_v44 = vld [vmem:[#allocation8 + $0x2a8] sm:$0xf]  ;;  %v1588_v45 = vld [vmem:[#allocation8 + $0x2b0] sm:$0xf0] }
  0x52   :  { %935 = vmatpush.bf16.msra.mxu0 %v1156_v40  ;;  %949 = vmatpush.bf16.msra.mxu1 %v1252_v42 }
  0x54   :  { %963 = vmatpush.bf16.msra.mxu2 %v1348_v58  ;;  %977 = vmatpush.bf16.msra.mxu3 %v1444_v60 }
  0x56   :  { %936 = vmatpush.bf16.msra.mxu0 %v1144_v52  ;;  %950 = vmatpush.bf16.msra.mxu1 %v1240_v54  ;;  %v1195_v52 = vld [vmem:[#allocation8 + $0x98] sm:$0xf] }
  0x57   :  { %v1196_v62 = vor.u32 %v1522_v53, %v1195_v52  ;;  %v1460_v53 = vor.u32 %v1588_v45, %v1459_v44 }
  0x58   :  { %964 = vmatpush.bf16.msra.mxu2 %v1336_v6  ;;  %978 = vmatpush.bf16.msra.mxu3 %v1432_v8  ;;  %v1183_v6 = vld [vmem:[#allocation8 + $0x80] sm:$0xf] }
  0x59   :  { %v1279_v8 = vld [vmem:[#allocation8 + $0x140] sm:$0xf]  ;;  %v1184_v16 = vor.u32 %v1519_v7, %v1183_v6  ;;  %v1435_v6 = vld [vmem:[#allocation8 + $0x278] sm:$0xf]  ;;  %v1582_v7 = vld [vmem:[#allocation8 + $0x280] sm:$0xf0] }
  0x5a   :  { %937 = vmatpush.bf16.msra.mxu0 %v1132_v0  ;;  %951 = vmatpush.bf16.msra.mxu1 %v1228_v2  ;;  %v1573_v0 = vld [vmem:[#allocation8 + $0x238] sm:$0xf0]  ;;  %v1280_v21 = vor.u32 %v1543_v9, %v1279_v8 }
  0x5c   :  { %965 = vmatpush.bf16.msra.mxu2 %v1324_v19  ;;  %979 = vmatpush.bf16.msra.mxu3 %v1420_v20 }
  0x5e   :  { %938 = vmatpush.bf16.msra.mxu0 %v1120_v12  ;;  %952 = vmatpush.bf16.msra.mxu1 %v1216_v14  ;;  %v1400_v14 = vor.u32 %v1573_v0, %v1399_v63  ;;  %v1507_v63 = vld [vmem:[#allocation8 + $0x28] sm:$0xf0]  ;;  %v1231_v0 = vld [vmem:[#allocation8 + $0xe0] sm:$0xf] }
  0x5f   :  { %v1232_v9 = vor.u32 %v1531_v1, %v1231_v0 }
  0x60   :  { %966 = vmatpush.bf16.msra.mxu2 %v1312_v23  ;;  %980 = vmatpush.bf16.msra.mxu3 %v1408_v26  ;;  %v1594_v23 = vld [vmem:[#allocation8 + $0x2e0] sm:$0xf0]  ;;  %v1267_v26 = vld [vmem:[#allocation8 + $0x128] sm:$0xf] }
  0x9e   :  { %v168_v28 = vpop.f32.mrf.mxu0  ;;  %v182_v29 = vpop.f32.mrf.mxu1 }
  0x9f   :  { %v169_v32 = vadd.f32 %v168_v28, %v99_v30  ;;  %v183_v33 = vadd.f32 %v182_v29, %v100_v31  ;;  %v1388_v28 = vor.u32 %v1570_v18, %v1387_v17  ;;  %v1484_v29 = vor.u32 %v1594_v23, %v1483_v22  ;;  %v1555_v17 = vld [vmem:[#allocation8 + $0x1a8] sm:$0xf0]  ;;  %v1423_v18 = vld [vmem:[#allocation8 + $0x260] sm:$0xf] }
  0xa1   :  { %v215_v40 = vmax.f32 %v169_v32, 0.0  ;;  %v216_v41 = vmax.f32 %v183_v33, 0.0  ;;  %v1268_v32 = vor.u32 %v1540_v27, %v1267_v26  ;;  %v1567_v33 = vld [vmem:[#allocation8 + $0x208] sm:$0xf0]  ;;  %v1315_v26 = vld [vmem:[#allocation8 + $0x188] sm:$0xf] }
  0xa2   :  { %v1552_v27 = vld [vmem:[#allocation8 + $0x190] sm:$0xf0] }
  0xa6   :  { %v196_v34 = vpop.f32.mrf.mxu2  ;;  %v210_v35 = vpop.f32.mrf.mxu3 }
  0xa7   :  { %v170_v36 = vpop.f32.mrf.mxu0  ;;  %v184_v37 = vpop.f32.mrf.mxu1  ;;  %v197_v58 = vadd.f32 %v196_v34, %v101_v46  ;;  %v211_v59 = vadd.f32 %v210_v35, %v102_v47  ;;  %v1471_v34 = vld [vmem:[#allocation8 + $0x2c0] sm:$0xf]  ;;  %v1591_v35 = vld [vmem:[#allocation8 + $0x2c8] sm:$0xf0] }
  0xa8   :  { %v171_v42 = vadd.f32 %v170_v36, %v99_v30  ;;  %v185_v43 = vadd.f32 %v184_v37, %v100_v31  ;;  %v1375_v30 = vld [vmem:[#allocation8 + $0x200] sm:$0xf]  ;;  %v1172_v31 = vor.u32 %v1516_v25, %v1171_v24  ;;  %v1159_v36 = vld [vmem:[#allocation8 + $0x50] sm:$0xf]  ;;  %v1513_v37 = vld [vmem:[#allocation8 + $0x58] sm:$0xf0] }
  0xa9   :  { %v217_v10 = vmax.f32 %v197_v58, 0.0  ;;  %v218_v11 = vmax.f32 %v211_v59, 0.0  ;;  %v1447_v58 = vld [vmem:[#allocation8 + $0x290] sm:$0xf]  ;;  %v1585_v59 = vld [vmem:[#allocation8 + $0x298] sm:$0xf0] }
  0xaa   :  { %v219_v48 = vmax.f32 %v171_v42, 0.0  ;;  %v220_v49 = vmax.f32 %v185_v43, 0.0  ;;  %v1363_v42 = vld [vmem:[#allocation8 + $0x1e8] sm:$0xf]  ;;  %v1564_v43 = vld [vmem:[#allocation8 + $0x1f0] sm:$0xf0] }
  0xab   :  { %v1364_v52 = vor.u32 %v1564_v43, %v1363_v42 }
  0xac   :  { %v1780_v54 = vpack.c.bf16 %v219_v48, %v215_v40  ;;  %v1782_v55 = vpack.c.bf16 %v220_v49, %v216_v41  ;;  %v1376_v40 = vor.u32 %v1567_v33, %v1375_v30  ;;  %v1472_v41 = vor.u32 %v1591_v35, %v1471_v34  ;;  %v1147_v48 = vld [vmem:[#allocation8 + $0x38] sm:$0xf]  ;;  %v1510_v49 = vld [vmem:[#allocation8 + $0x40] sm:$0xf0] }
  0xad   :  { %v1316_v30 = vor.u32 %v1552_v27, %v1315_v26 }
  0xae   :  { %v198_v60 = vpop.f32.mrf.mxu2  ;;  %v212_v61 = vpop.f32.mrf.mxu3  ;;  %883 = vmatmul.bf16.vlgmr.msrb.gmra.mxu0 %v1780_v54  ;;  %897 = vmatmul.bf16.vlgmr.msrb.gmra.mxu1 %v1782_v55 }
  0xaf   :  { %v199_v2 = vadd.f32 %v198_v60, %v101_v46  ;;  %v213_v3 = vadd.f32 %v212_v61, %v102_v47  ;;  %987 = vmatpush.bf16.msrb.mxu0 %v1208_v50  ;;  %1001 = vmatpush.bf16.msrb.mxu1 %v1304_v51  ;;  %v1160_v46 = vor.u32 %v1513_v37, %v1159_v36  ;;  %v1243_v50 = vld [vmem:[#allocation8 + $0xf8] sm:$0xf]  ;;  %v1534_v51 = vld [vmem:[#allocation8 + $0x100] sm:$0xf0] }
  0xb0   :  { %v1256_v47 = vor.u32 %v1537_v39, %v1255_v38  ;;  %v1148_v60 = vor.u32 %v1510_v49, %v1147_v48  ;;  %v1244_v61 = vor.u32 %v1534_v51, %v1243_v50 }
  0xb1   :  { %v221_v12 = vmax.f32 %v199_v2, 0.0  ;;  %v222_v13 = vmax.f32 %v213_v3, 0.0  ;;  %v1352_v2 = vor.u32 %v1561_v57, %v1351_v56  ;;  %v1448_v3 = vor.u32 %v1585_v59, %v1447_v58 }
  0xb3   :  { %v1786_v19 = vpack.c.bf16 %v221_v12, %v217_v10  ;;  %v1788_v20 = vpack.c.bf16 %v222_v13, %v218_v11  ;;  %988 = vmatpush.bf16.msrb.mxu0 %v1196_v62  ;;  %1002 = vmatpush.bf16.msrb.mxu1 %v1292_v4  ;;  %v1135_v62 = vld [vmem:[#allocation8 + $0x20] sm:$0xf]  ;;  %v1339_v4 = vld [vmem:[#allocation8 + $0x1b8] sm:$0xf]  ;;  %v1123_v10 = vld [vmem:[#allocation8 + $0x8] sm:$0xf] }
  0xb4   :  { %v1136_v8 = vor.u32 %v1507_v63, %v1135_v62  ;;  %v1504_v11 = vld [vmem:[#allocation8 + $0x10] sm:$0xf0]  ;;  %v1219_v12 = vld [vmem:[#allocation8 + $0xc8] sm:$0xf] }
  0xb5   :  { %911 = vmatmul.bf16.vlgmr.msrb.gmra.mxu2 %v1786_v19  ;;  %925 = vmatmul.bf16.vlgmr.msrb.gmra.mxu3 %v1788_v20  ;;  %v1528_v13 = vld [vmem:[#allocation8 + $0xd0] sm:$0xf0]  ;;  %v1124_v22 = vor.u32 %v1504_v11, %v1123_v10 }
  0xb6   :  { %1015 = vmatpush.bf16.msrb.mxu2 %v1400_v14  ;;  %1029 = vmatpush.bf16.msrb.mxu3 %v1496_v15  ;;  %v1340_v14 = vor.u32 %v1558_v5, %v1339_v4  ;;  %v1436_v15 = vor.u32 %v1582_v7, %v1435_v6  ;;  %v1220_v23 = vor.u32 %v1528_v13, %v1219_v12 }
  0xb7   :  { %989 = vmatpush.bf16.msrb.mxu0 %v1184_v16  ;;  %1003 = vmatpush.bf16.msrb.mxu1 %v1280_v21  ;;  %v1327_v16 = vld [vmem:[#allocation8 + $0x1a0] sm:$0xf]  ;;  %v1579_v21 = vld [vmem:[#allocation8 + $0x268] sm:$0xf0] }
  0xb8   :  { %v1328_v24 = vor.u32 %v1555_v17, %v1327_v16  ;;  %v1424_v25 = vor.u32 %v1579_v21, %v1423_v18 }
  0xba   :  { %1016 = vmatpush.bf16.msrb.mxu2 %v1388_v28  ;;  %1030 = vmatpush.bf16.msrb.mxu3 %v1484_v29  ;;  %v1411_v28 = vld [vmem:[#allocation8 + $0x248] sm:$0xf]  ;;  %v1576_v29 = vld [vmem:[#allocation8 + $0x250] sm:$0xf0] }
  0xbb   :  { %990 = vmatpush.bf16.msrb.mxu0 %v1172_v31  ;;  %1004 = vmatpush.bf16.msrb.mxu1 %v1268_v32  ;;  %v1412_v31 = vor.u32 %v1576_v29, %v1411_v28 }
  0xbe   :  { %1017 = vmatpush.bf16.msrb.mxu2 %v1376_v40  ;;  %1031 = vmatpush.bf16.msrb.mxu3 %v1472_v41 }
  0xbf   :  { %939 = vmatmul.bf16.vlgmr.msra.gmra.mxu0 %v1780_v54  ;;  %953 = vmatmul.bf16.vlgmr.msra.gmra.mxu1 %v1782_v55 }
  0xc0   :  { %991 = vmatpush.bf16.msrb.mxu0 %v1160_v46  ;;  %1005 = vmatpush.bf16.msrb.mxu1 %v1256_v47  ;;  %v1049_v47 = vld [vmem:[%s1820_s5] sm:$0x7] }
  0xc2   :  { %1018 = vmatpush.bf16.msrb.mxu2 %v1364_v52  ;;  %1032 = vmatpush.bf16.msrb.mxu3 %v1460_v53  ;;  %v1050_v53 = vunpack.c.l.bf16 %v1049_v47 }
  0xc4   :  { %992 = vmatpush.bf16.msrb.mxu0 %v1148_v60  ;;  %1006 = vmatpush.bf16.msrb.mxu1 %v1244_v61  ;;  %v1053_v60 = vperm.slane %v1050_v53, 2  ;;  %v1054_v5 = vperm.slane %v1050_v53, 4 }
  0xc5   :  { %967 = vmatmul.bf16.vlgmr.msra.gmra.mxu2 %v1786_v19  ;;  %981 = vmatmul.bf16.vlgmr.msra.gmra.mxu3 %v1788_v20 }
  0xc6   :  { %1019 = vmatpush.bf16.msrb.mxu2 %v1352_v2  ;;  %1033 = vmatpush.bf16.msrb.mxu3 %v1448_v3  ;;  %v1052_v2 = vperm.slane %v1050_v53, 0  ;;  %v1059_v4 = vperm.slane %v1053_v60, 0  ;;  %v1060_v17 = vperm.slane %v1054_v5, 0 }
  0xc8   :  { %993 = vmatpush.bf16.msrb.mxu0 %v1136_v8  ;;  %1007 = vmatpush.bf16.msrb.mxu1 %v1232_v9 }
  0xca   :  { %1020 = vmatpush.bf16.msrb.mxu2 %v1340_v14  ;;  %1034 = vmatpush.bf16.msrb.mxu3 %v1436_v15  ;;  %v1058_v14 = vperm.slane %v1052_v2, 0 }
  0xcc   :  { %994 = vmatpush.bf16.msrb.mxu0 %v1124_v22  ;;  %1008 = vmatpush.bf16.msrb.mxu1 %v1220_v23 }
  0xce   :  { %1021 = vmatpush.bf16.msrb.mxu2 %v1328_v24  ;;  %1035 = vmatpush.bf16.msrb.mxu3 %v1424_v25 }
  0xcf   :  { %995 = vmatmul.bf16.vlgmr.msrb.gmra.mxu0 %v1780_v54  ;;  %1009 = vmatmul.bf16.vlgmr.msrb.gmra.mxu1 %v1782_v55  ;;  %v355_v54 = vld [vmem:[%s1819_s4] sm:$0x7] }
  0xd0   :  { %v358_v42 = vperm.slane %v355_v54, 1  ;;  %v357_v43 = vperm.slane %v355_v54, 0  ;;  %v359_v52 = vperm.slane %v355_v54, 2 }
  0xd2   :  { %1022 = vmatpush.bf16.msrb.mxu2 %v1316_v30  ;;  %1036 = vmatpush.bf16.msrb.mxu3 %v1412_v31 }
  0xd5   :  { %1023 = vmatmul.bf16.vlgmr.msrb.gmra.mxu2 %v1786_v19  ;;  %1037 = vmatmul.bf16.vlgmr.msrb.gmra.mxu3 %v1788_v20 }
 0x12b   :  { %v884_v32 = vpop.f32.mrf.mxu0  ;;  %v898_v33 = vpop.f32.mrf.mxu1 }
 0x12c   :  { %v885_v46 = vadd.f32 %v884_v32, %v357_v43 }
 0x12e   :  { %v899_v50 = vadd.f32 %v898_v33, %v885_v46 }
 0x133   :  { %v886_v34 = vpop.f32.mrf.mxu0  ;;  %v900_v35 = vpop.f32.mrf.mxu1 }
 0x134   :  { %v887_v61 = vadd.f32 %v886_v34, %v357_v43 }
 0x136   :  { %v901_v6 = vadd.f32 %v900_v35, %v887_v61 }
 0x138   :  { %v912_v36 = vpop.f32.mrf.mxu2  ;;  %v926_v37 = vpop.f32.mrf.mxu3 }
 0x139   :  { %v913_v58 = vadd.f32 %v912_v36, %v899_v50 }
 0x13b   :  { %v927_v1 = vadd.f32 %v926_v37, %v913_v58 }
 0x13c   :  { %v940_v38 = vpop.f32.mrf.mxu0  ;;  %v954_v39 = vpop.f32.mrf.mxu1 }
 0x13d   :  { %v941_v20 = vadd.f32 %v940_v38, %v358_v42  ;;  %v1043_v13 = vmax.f32 %v927_v1, 0.0 }
 0x13f   :  { %v955_v48 = vadd.f32 %v954_v39, %v941_v20  ;;  %v1061_v24 = vmul.f32 %v1058_v14, %v1043_v13 }
 0x140   :  { %v914_v40 = vpop.f32.mrf.mxu2  ;;  %v928_v41 = vpop.f32.mrf.mxu3 }
 0x141   :  { %v915_v15 = vadd.f32 %v914_v40, %v901_v6 }
 0x143   :  { %v929_v25 = vadd.f32 %v928_v41, %v915_v15  ;;  %v1076_v41 = vstv %s1821_s6 }
 0x144   :  { %v942_v55 = vpop.f32.mrf.mxu0  ;;  %v956_v45 = vpop.f32.mrf.mxu1 }
 0x145   :  { %v943_v59 = vadd.f32 %v942_v55, %v358_v42  ;;  %v1046_v33 = vmax.f32 %v929_v25, 0.0 }
 0x147   :  { %v957_v3 = vadd.f32 %v956_v45, %v943_v59  ;;  %v1064_v39 = vmul.f32 %v1058_v14, %v1046_v33 }
 0x148   :  { %v968_v19 = vpop.f32.mrf.mxu2  ;;  %v982_v44 = vpop.f32.mrf.mxu3 }
 0x149   :  { %v969_v51 = vadd.f32 %v968_v19, %v955_v48 }
 0x14b   :  { %v983_v62 = vadd.f32 %v982_v44, %v969_v51 }
 0x14c   :  { %v996_v49 = vpop.f32.mrf.mxu0  ;;  %v1010_v0 = vpop.f32.mrf.mxu1 }
 0x14d   :  { %v997_v63 = vadd.f32 %v996_v49, %v359_v52  ;;  %v1044_v7 = vmax.f32 %v983_v62, 0.0 }
 0x14f   :  { %v1011_v8 = vadd.f32 %v1010_v0, %v997_v63  ;;  %v1062_v18 = vmul.f32 %v1059_v4, %v1044_v7 }
 0x150   :  { %v970_v56 = vpop.f32.mrf.mxu2  ;;  %v984_v57 = vpop.f32.mrf.mxu3 }
 0x151   :  { %v971_v9 = vadd.f32 %v970_v56, %v957_v3  ;;  %v1067_v31 = vadd.f32 %v1062_v18, %v1061_v24 }
 0x153   :  { %v985_v21 = vadd.f32 %v984_v57, %v971_v9 }
 0x154   :  { %v998_v10 = vpop.f32.mrf.mxu0  ;;  %v1012_v27 = vpop.f32.mrf.mxu1 }
 0x155   :  { %v999_v22 = vadd.f32 %v998_v10, %v359_v52  ;;  %v1047_v28 = vmax.f32 %v985_v21, 0.0 }
 0x157   :  { %v1013_v29 = vadd.f32 %v1012_v27, %v999_v22  ;;  %v1065_v37 = vmul.f32 %v1059_v4, %v1047_v28 }
 0x158   :  { %v1024_v11 = vpop.f32.mrf.mxu2  ;;  %v1038_v12 = vpop.f32.mrf.mxu3 }
 0x159   :  { %v1025_v16 = vadd.f32 %v1024_v11, %v1011_v8  ;;  %v1071_v55 = vadd.f32 %v1065_v37, %v1064_v39 }
 0x15b   :  { %v1039_v23 = vadd.f32 %v1038_v12, %v1025_v16 }
 0x15d   :  { %v1045_v26 = vmax.f32 %v1039_v23, 0.0 }
 0x15f   :  { %v1063_v30 = vmul.f32 %v1060_v17, %v1045_v26 }
 0x160   :  { %v1026_v32 = vpop.f32.mrf.mxu2  ;;  %v1040_v36 = vpop.f32.mrf.mxu3 }
 0x161   :  { %v1027_v34 = vadd.f32 %v1026_v32, %v1013_v29  ;;  %v1068_v35 = vadd.f32 %v1067_v31, %v1063_v30 }
 0x163   :  { %v1041_v38 = vadd.f32 %v1040_v36, %v1027_v34  ;;  %1069 = vadd.xlane.f32.xlu0 %v1068_v35 }
 0x165   :  { %v1048_v40 = vmax.f32 %v1041_v38, 0.0 }
 0x167   :  { %v1066_v54 = vmul.f32 %v1060_v17, %v1048_v40 }
 0x169   :  { %v1072_v42 = vadd.f32 %v1071_v55, %v1066_v54 }
 0x16b   :  { %1073 = vadd.xlane.f32.xlu0 %v1072_v42 }
 0x1d6   :  { %v1070_v43 = vpop.xlane.xlu0 %1069 }
 0x1d7   :  { %v1077_v19 = vadd.f32 %v1076_v41, %v1070_v43 }
 0x1d9   :  { %1080 = vst.msk [vmem:[%s1822_s7] sm:$0xff] %vm1079_vm2, %v1077_v19 }
 0x1de   :  { %v1074_v44 = vpop.xlane.xlu0 %1073 }
 0x1df   :  { %v1078_v20 = vadd.f32 %v1076_v41, %v1074_v44 }
 0x1e1   :  { %1081 = vst.msk [vmem:[%s1822_s7 + $0x8] sm:$0xff] %vm1079_vm2, %v1078_v20 }
 0x1e2   :  { %1086 = vsyncpa [#allocation4], 1 }
 0x1e3   :  { %1087 = vsyncpa [#allocation6], 1 }
 0x1e4   :  { %1088 = vsyncpa [#allocation9], 1 }

</bundles_post_ra>
